<compile_context>
chip_gen: v7x
topology: tpu7x:2x2x1
jax: 0.10.0
libtpu: 0.0.40
codegen_flags: <defaults>
</compile_context>

<pallas_src>
import functools

import jax
import jax.numpy as jnp
from jax import lax
from jax.experimental import pallas as pl
from jax.experimental.pallas import tpu as pltpu

LEAK = 0.2     # F.leaky_relu negative slope used in the module
DROP_P = 0.5   # F.dropout default (training=True in the reference forward)

# murmur3 fmix32 constants as signed int32
_M1 = -2048144789      # 0x85EBCA6B
_M2 = -1028477387      # 0xC2B2AE35
_GOLD = 0x9E3779B9


def _fmix32(h):
    """murmur3 finalizer on int32 values (logical shifts emulated via mask)."""
    h = h ^ ((h >> 16) & jnp.int32(0xFFFF))
    h = h * jnp.int32(_M1)
    h = h ^ ((h >> 13) & jnp.int32(0x7FFFF))
    h = h * jnp.int32(_M2)
    h = h ^ ((h >> 16) & jnp.int32(0xFFFF))
    return h


def _dropout_keep_mask(shape, tm, ncols, seed):
    """Deterministic Bernoulli(0.5) keep-mask keyed on (global row, column, seed).

    Uses only portable integer VPU ops (2-D iota, add, mul, xor, shift, and), so it
    lowers under Mosaic and under the CPU interpret fallback alike.  Independent of
    the batch-tile decomposition.
    """
    # TODO(synk): cannot reproduce torch's RNG stream for F.dropout; this is an
    # equivalent-distribution deterministic replacement.
    rows = lax.broadcasted_iota(jnp.int32, shape, 0) + pl.program_id(0) * tm
    cols = lax.broadcasted_iota(jnp.int32, shape, 1)
    seed_mix = (int(seed) * _GOLD + 0x7F4A7C15) & 0xFFFFFFFF
    if seed_mix >= (1 << 31):
        seed_mix -= 1 << 32
    h = rows * jnp.int32(ncols) + cols + jnp.int32(seed_mix)
    h = _fmix32(h)
    return (h & jnp.int32(1)) == 0


# ------------------------------ fused kernel ------------------------------- #

def _zdisc_kernel(x_ref, w1_ref, b1_ref, w2_ref, b2_ref, w3_ref, b3_ref, o_ref,
                  *, seed, tm, hidden):
    # x: (TM, Z) f32 | w1: (Z, D) bf16 | w2: (D, D) bf16 | w3: (D, DP) bf16 (padded)
    # b1/b2: (1, D) f32 | b3: (1, DP) f32 | o: (TM, DP) bf16

    # Linear 1 + LeakyReLU(0.2)   (cast x -> bf16 in-kernel; MXU, f32 accumulation)
    x = x_ref[...].astype(jnp.bfloat16)
    h = jnp.dot(x, w1_ref[...], preferred_element_type=jnp.float32) + b1_ref[...]
    h = jnp.where(h > 0, h, LEAK * h)

    # Linear 2 + LeakyReLU(0.2)
    h = jnp.dot(h.astype(jnp.bfloat16), w2_ref[...],
                preferred_element_type=jnp.float32) + b2_ref[...]
    h = jnp.where(h > 0, h, LEAK * h)

    # Training-mode dropout, p = 0.5: keep w.p. 0.5, scale kept activations by 1/(1-p).
    keep = _dropout_keep_mask(h.shape, tm, hidden, seed)
    h = jnp.where(keep, h * jnp.float32(1.0 / (1.0 - DROP_P)), jnp.float32(0.0))

    # Linear 3 (output zero-padded to 128 lanes) + numerically-stable sigmoid.
    z = jnp.dot(h.astype(jnp.bfloat16), w3_ref[...],
                preferred_element_type=jnp.float32) + b3_ref[...]
    e = jnp.exp(-jnp.abs(z))           # exp of non-positive args only -> no overflow
    r = 1.0 / (1.0 + e)
    o_ref[...] = jnp.where(z >= 0, r, 1.0 - r).astype(o_ref.dtype)   # full-width vst


# --------------------------------- wrapper ---------------------------------- #

def _round_up(v, m):
    return (v + m - 1) // m * m


def zdiscriminator_forward(x, params, seed=0):
    """x: (B, z_size) float32 -> (B, 1) float32, ZDiscriminator.forward (training mode)."""
    B, Z = x.shape
    D = params["w2"].shape[0]      # hidden dim (128)
    DP = params["w3"].shape[1]     # padded output dim (128)

    # Large batch tiles amortize the ~0.35 us per-grid-step overhead; choose ~ceil(B/2)
    # (capped at 2048, min 16) so large batches still give >=2 "parallel" grid steps for
    # v7x megacore sharding.  Per-step VMEM at tm=2048 is only a few MiB on every gen.
    tm = min(_round_up(max(-(-B // 2), 16), 16), 2048)
    Bp = _round_up(B, tm)
    # Pad only the remainder rows (no-op when B divides the tile); cast happens in-kernel.
    x_in = x if Bp == B else jnp.pad(x, ((0, Bp - B), (0, 0)))

    kernel = functools.partial(_zdisc_kernel, seed=int(seed), tm=tm, hidden=D)
    fixed = lambda i: (0, 0)       # weights / biases: same block every step (resident)

    out = pl.pallas_call(
        kernel,
        out_shape=jax.ShapeDtypeStruct((Bp, DP), jnp.bfloat16),
        grid=(Bp // tm,),
        in_specs=[
            pl.BlockSpec((tm, Z), lambda i: (i, 0)),   # x tile (f32, cast in-kernel)
            pl.BlockSpec((Z, D), fixed),               # w1 (bf16)
            pl.BlockSpec((1, D), fixed),               # b1 (f32)
            pl.BlockSpec((D, D), fixed),               # w2 (bf16)
            pl.BlockSpec((1, D), fixed),               # b2 (f32)
            pl.BlockSpec((D, DP), fixed),              # w3 (bf16, padded to 128 cols)
            pl.BlockSpec((1, DP), fixed),              # b3 (f32, padded to 128 cols)
        ],
        out_specs=pl.BlockSpec((tm, DP), lambda i: (i, 0)),
        compiler_params=pltpu.CompilerParams(dimension_semantics=("parallel",)),
    )(x_in, params["w1"], params["b1"], params["w2"], params["b2"],
      params["w3"], params["b3"])

    return out[:B, :1].astype(jnp.float32)


# ------------------------------ params / init ------------------------------- #

def init_zdiscriminator_params(key, z_size, d=128, std=0.02, out_pad=128):
    """weight_init(mean=0, std=0.02) semantics: normal weights, zero biases.
    Weights stored in bf16 once (MXU operands); biases stay f32 (accumulator add).
    The (d, 1) output layer is zero-padded to (d, out_pad) for lane-dense stores."""
    k1, k2, k3 = jax.random.split(key, 3)
    w1 = (std * jax.random.normal(k1, (z_size, d), jnp.float32)).astype(jnp.bfloat16)
    w2 = (std * jax.random.normal(k2, (d, d), jnp.float32)).astype(jnp.bfloat16)
    w3_col = std * jax.random.normal(k3, (d, 1), jnp.float32)
    w3 = jnp.zeros((d, out_pad), jnp.float32).at[:, :1].set(w3_col).astype(jnp.bfloat16)
    return {
        "w1": w1, "b1": jnp.zeros((1, d), jnp.float32),
        "w2": w2, "b2": jnp.zeros((1, d), jnp.float32),
        "w3": w3, "b3": jnp.zeros((1, out_pad), jnp.float32),
    }


if __name__ == "__main__":
    z_size = 32
    batch = 2
    key = jax.random.PRNGKey(0)
    pkey, xkey = jax.random.split(key)
    params = init_zdiscriminator_params(pkey, z_size)
    x = jax.random.normal(xkey, (batch, z_size), jnp.float32)

    out = zdiscriminator_forward(x, params, seed=0)
    out = jax.block_until_ready(out)

    assert out.shape == (batch, 1)
    assert bool(jnp.all(jnp.isfinite(out)))
    assert bool(jnp.all((out > 0.0) & (out < 1.0)))   # sigmoid range
    print("KERNEL_OK")
</pallas_src>

<mosaic_0001>
module attributes {stable_mosaic.version = 11 : i64} {
  func.func @_zdisc_kernel(%arg0: i32, %arg1: memref<16x32xf32, #tpu.memory_space<vmem>>, %arg2: memref<32x128xbf16, #tpu.memory_space<vmem>>, %arg3: memref<1x128xf32, #tpu.memory_space<vmem>>, %arg4: memref<128x128xbf16, #tpu.memory_space<vmem>>, %arg5: memref<1x128xf32, #tpu.memory_space<vmem>>, %arg6: memref<128x128xbf16, #tpu.memory_space<vmem>>, %arg7: memref<1x128xf32, #tpu.memory_space<vmem>>, %arg8: memref<16x128xbf16, #tpu.memory_space<vmem>>) attributes {dimension_semantics = [#tpu.dimension_semantics<parallel>], iteration_bounds = array<i64: 1>, scalar_prefetch = 0 : i64, scratch_operands = 0 : i64, tpu.core_type = #tpu.core_type<tc>, window_params = [{transform_indices = @transform_0, window_bounds = array<i64: 16, 32>}, {pipeline_mode = #tpu.pipeline_mode<synchronous>, transform_indices = @transform_1, window_bounds = array<i64: 32, 128>}, {pipeline_mode = #tpu.pipeline_mode<synchronous>, transform_indices = @transform_2, window_bounds = array<i64: 1, 128>}, {pipeline_mode = #tpu.pipeline_mode<synchronous>, transform_indices = @transform_3, window_bounds = array<i64: 128, 128>}, {pipeline_mode = #tpu.pipeline_mode<synchronous>, transform_indices = @transform_4, window_bounds = array<i64: 1, 128>}, {pipeline_mode = #tpu.pipeline_mode<synchronous>, transform_indices = @transform_5, window_bounds = array<i64: 128, 128>}, {pipeline_mode = #tpu.pipeline_mode<synchronous>, transform_indices = @transform_6, window_bounds = array<i64: 1, 128>}, {transform_indices = @transform_7, window_bounds = array<i64: 16, 128>}]} {
    %c0 = arith.constant 0 : index
    %c0_0 = arith.constant 0 : index
    %0 = vector.load %arg1[%c0, %c0_0] : memref<16x32xf32, #tpu.memory_space<vmem>>, vector<16x32xf32>
    %1 = arith.truncf %0 : vector<16x32xf32> to vector<16x32xbf16>
    %c0_1 = arith.constant 0 : index
    %c0_2 = arith.constant 0 : index
    %2 = vector.load %arg2[%c0_1, %c0_2] : memref<32x128xbf16, #tpu.memory_space<vmem>>, vector<32x128xbf16>
    %cst = arith.constant dense<0.000000e+00> : vector<16x128xf32>
    %3 = tpu.matmul %1, %2, %cst {dimension_numbers = #tpu.dot_dimension_numbers<[1], [0], [0], [1], [0, 0, 1, 1], [], []>} : vector<16x32xbf16>, vector<32x128xbf16>, vector<16x128xf32> -> vector<16x128xf32>
    %c0_3 = arith.constant 0 : index
    %c0_4 = arith.constant 0 : index
    %4 = vector.load %arg3[%c0_3, %c0_4] : memref<1x128xf32, #tpu.memory_space<vmem>>, vector<1x128xf32>
    %5 = vector.broadcast %4 : vector<1x128xf32> to vector<16x128xf32>
    %6 = arith.addf %3, %5 : vector<16x128xf32>
    %cst_5 = arith.constant 0.000000e+00 : f32
    %7 = vector.broadcast %cst_5 : f32 to vector<16x128xf32>
    %8 = arith.cmpf ogt, %6, %7 : vector<16x128xf32>
    %cst_6 = arith.constant 2.000000e-01 : f32
    %9 = vector.broadcast %cst_6 : f32 to vector<16x128xf32>
    %10 = arith.mulf %9, %6 : vector<16x128xf32>
    %11 = arith.select %8, %6, %10 : vector<16x128xi1>, vector<16x128xf32>
    %12 = arith.truncf %11 : vector<16x128xf32> to vector<16x128xbf16>
    %c0_7 = arith.constant 0 : index
    %c0_8 = arith.constant 0 : index
    %13 = vector.load %arg4[%c0_7, %c0_8] : memref<128x128xbf16, #tpu.memory_space<vmem>>, vector<128x128xbf16>
    %cst_9 = arith.constant dense<0.000000e+00> : vector<16x128xf32>
    %14 = tpu.matmul %12, %13, %cst_9 {dimension_numbers = #tpu.dot_dimension_numbers<[1], [0], [0], [1], [0, 0, 1, 1], [], []>} : vector<16x128xbf16>, vector<128x128xbf16>, vector<16x128xf32> -> vector<16x128xf32>
    %c0_10 = arith.constant 0 : index
    %c0_11 = arith.constant 0 : index
    %15 = vector.load %arg5[%c0_10, %c0_11] : memref<1x128xf32, #tpu.memory_space<vmem>>, vector<1x128xf32>
    %16 = vector.broadcast %15 : vector<1x128xf32> to vector<16x128xf32>
    %17 = arith.addf %14, %16 : vector<16x128xf32>
    %cst_12 = arith.constant 0.000000e+00 : f32
    %18 = vector.broadcast %cst_12 : f32 to vector<16x128xf32>
    %19 = arith.cmpf ogt, %17, %18 : vector<16x128xf32>
    %cst_13 = arith.constant 2.000000e-01 : f32
    %20 = vector.broadcast %cst_13 : f32 to vector<16x128xf32>
    %21 = arith.mulf %20, %17 : vector<16x128xf32>
    %22 = arith.select %19, %17, %21 : vector<16x128xi1>, vector<16x128xf32>
    %23 = tpu.iota {dimensions = array<i32: 0>} : vector<16x128xi32>
    %c16_i32 = arith.constant 16 : i32
    %24 = arith.muli %arg0, %c16_i32 : i32
    %25 = vector.broadcast %24 : i32 to vector<16x128xi32>
    %26 = arith.addi %23, %25 : vector<16x128xi32>
    %27 = tpu.iota {dimensions = array<i32: 1>} : vector<16x128xi32>
    %c128_i32 = arith.constant 128 : i32
    %28 = vector.broadcast %c128_i32 : i32 to vector<16x128xi32>
    %29 = arith.muli %26, %28 : vector<16x128xi32>
    %30 = arith.addi %29, %27 : vector<16x128xi32>
    %c2135587861_i32 = arith.constant 2135587861 : i32
    %31 = vector.broadcast %c2135587861_i32 : i32 to vector<16x128xi32>
    %32 = arith.addi %30, %31 : vector<16x128xi32>
    %c16_i32_14 = arith.constant 16 : i32
    %33 = vector.broadcast %c16_i32_14 : i32 to vector<16x128xi32>
    %34 = arith.shrsi %32, %33 : vector<16x128xi32>
    %c65535_i32 = arith.constant 65535 : i32
    %35 = vector.broadcast %c65535_i32 : i32 to vector<16x128xi32>
    %36 = arith.andi %34, %35 : vector<16x128xi32>
    %37 = arith.xori %32, %36 : vector<16x128xi32>
    %c-2048144789_i32 = arith.constant -2048144789 : i32
    %38 = vector.broadcast %c-2048144789_i32 : i32 to vector<16x128xi32>
    %39 = arith.muli %37, %38 : vector<16x128xi32>
    %c13_i32 = arith.constant 13 : i32
    %40 = vector.broadcast %c13_i32 : i32 to vector<16x128xi32>
    %41 = arith.shrsi %39, %40 : vector<16x128xi32>
    %c524287_i32 = arith.constant 524287 : i32
    %42 = vector.broadcast %c524287_i32 : i32 to vector<16x128xi32>
    %43 = arith.andi %41, %42 : vector<16x128xi32>
    %44 = arith.xori %39, %43 : vector<16x128xi32>
    %c-1028477387_i32 = arith.constant -1028477387 : i32
    %45 = vector.broadcast %c-1028477387_i32 : i32 to vector<16x128xi32>
    %46 = arith.muli %44, %45 : vector<16x128xi32>
    %c16_i32_15 = arith.constant 16 : i32
    %47 = vector.broadcast %c16_i32_15 : i32 to vector<16x128xi32>
    %48 = arith.shrsi %46, %47 : vector<16x128xi32>
    %c65535_i32_16 = arith.constant 65535 : i32
    %49 = vector.broadcast %c65535_i32_16 : i32 to vector<16x128xi32>
    %50 = arith.andi %48, %49 : vector<16x128xi32>
    %51 = arith.xori %46, %50 : vector<16x128xi32>
    %c1_i32 = arith.constant 1 : i32
    %52 = vector.broadcast %c1_i32 : i32 to vector<16x128xi32>
    %53 = arith.andi %51, %52 : vector<16x128xi32>
    %c0_i32 = arith.constant 0 : i32
    %54 = vector.broadcast %c0_i32 : i32 to vector<16x128xi32>
    %55 = arith.cmpi eq, %53, %54 : vector<16x128xi32>
    %cst_17 = arith.constant 2.000000e+00 : f32
    %56 = vector.broadcast %cst_17 : f32 to vector<16x128xf32>
    %57 = arith.mulf %22, %56 : vector<16x128xf32>
    %cst_18 = arith.constant 0.000000e+00 : f32
    %58 = vector.broadcast %cst_18 : f32 to vector<16x128xf32>
    %59 = arith.select %55, %57, %58 : vector<16x128xi1>, vector<16x128xf32>
    %60 = arith.truncf %59 : vector<16x128xf32> to vector<16x128xbf16>
    %c0_19 = arith.constant 0 : index
    %c0_20 = arith.constant 0 : index
    %61 = vector.load %arg6[%c0_19, %c0_20] : memref<128x128xbf16, #tpu.memory_space<vmem>>, vector<128x128xbf16>
    %cst_21 = arith.constant dense<0.000000e+00> : vector<16x128xf32>
    %62 = tpu.matmul %60, %61, %cst_21 {dimension_numbers = #tpu.dot_dimension_numbers<[1], [0], [0], [1], [0, 0, 1, 1], [], []>} : vector<16x128xbf16>, vector<128x128xbf16>, vector<16x128xf32> -> vector<16x128xf32>
    %c0_22 = arith.constant 0 : index
    %c0_23 = arith.constant 0 : index
    %63 = vector.load %arg7[%c0_22, %c0_23] : memref<1x128xf32, #tpu.memory_space<vmem>>, vector<1x128xf32>
    %64 = vector.broadcast %63 : vector<1x128xf32> to vector<16x128xf32>
    %65 = arith.addf %62, %64 : vector<16x128xf32>
    %66 = math.absf %65 : vector<16x128xf32>
    %cst_24 = arith.constant 0.000000e+00 : f32
    %67 = vector.broadcast %cst_24 : f32 to vector<16x128xf32>
    %68 = arith.subf %67, %66 : vector<16x128xf32>
    %69 = math.exp %68 : vector<16x128xf32>
    %cst_25 = arith.constant 1.000000e+00 : f32
    %70 = vector.broadcast %cst_25 : f32 to vector<16x128xf32>
    %71 = arith.addf %70, %69 : vector<16x128xf32>
    %cst_26 = arith.constant 1.000000e+00 : f32
    %72 = vector.broadcast %cst_26 : f32 to vector<16x128xf32>
    %73 = arith.divf %72, %71 : vector<16x128xf32>
    %cst_27 = arith.constant 0.000000e+00 : f32
    %74 = vector.broadcast %cst_27 : f32 to vector<16x128xf32>
    %75 = arith.cmpf oge, %65, %74 : vector<16x128xf32>
    %cst_28 = arith.constant 1.000000e+00 : f32
    %76 = vector.broadcast %cst_28 : f32 to vector<16x128xf32>
    %77 = arith.subf %76, %73 : vector<16x128xf32>
    %78 = arith.select %75, %73, %77 : vector<16x128xi1>, vector<16x128xf32>
    %79 = arith.truncf %78 : vector<16x128xf32> to vector<16x128xbf16>
    %c0_29 = arith.constant 0 : index
    %c0_30 = arith.constant 0 : index
    %80 = vector.load %arg8[%c0_29, %c0_30] : memref<16x128xbf16, #tpu.memory_space<vmem>>, vector<16x128xbf16>
    tpu.vector_store %arg8[%c0_29, %c0_30], %79 {strides = array<i32>} : memref<16x128xbf16, #tpu.memory_space<vmem>>, vector<16x128xbf16>,
    return
  }
  func.func @transform_0(%arg0: i32) -> (i32, i32) {
    %c0_i32 = arith.constant 0 : i32
    %c0_i32_0 = arith.constant 0 : i32
    return %arg0, %c0_i32 : i32, i32
  }
  func.func @transform_1(%arg0: i32) -> (i32, i32) {
    %c0_i32 = arith.constant 0 : i32
    %c0_i32_0 = arith.constant 0 : i32
    %c0_i32_1 = arith.constant 0 : i32
    return %c0_i32, %c0_i32_0 : i32, i32
  }
  func.func @transform_2(%arg0: i32) -> (i32, i32) {
    %c0_i32 = arith.constant 0 : i32
    %c0_i32_0 = arith.constant 0 : i32
    %c0_i32_1 = arith.constant 0 : i32
    return %c0_i32, %c0_i32_0 : i32, i32
  }
  func.func @transform_3(%arg0: i32) -> (i32, i32) {
    %c0_i32 = arith.constant 0 : i32
    %c0_i32_0 = arith.constant 0 : i32
    %c0_i32_1 = arith.constant 0 : i32
    return %c0_i32, %c0_i32_0 : i32, i32
  }
  func.func @transform_4(%arg0: i32) -> (i32, i32) {
    %c0_i32 = arith.constant 0 : i32
    %c0_i32_0 = arith.constant 0 : i32
    %c0_i32_1 = arith.constant 0 : i32
    return %c0_i32, %c0_i32_0 : i32, i32
  }
  func.func @transform_5(%arg0: i32) -> (i32, i32) {
    %c0_i32 = arith.constant 0 : i32
    %c0_i32_0 = arith.constant 0 : i32
    %c0_i32_1 = arith.constant 0 : i32
    return %c0_i32, %c0_i32_0 : i32, i32
  }
  func.func @transform_6(%arg0: i32) -> (i32, i32) {
    %c0_i32 = arith.constant 0 : i32
    %c0_i32_0 = arith.constant 0 : i32
    %c0_i32_1 = arith.constant 0 : i32
    return %c0_i32, %c0_i32_0 : i32, i32
  }
  func.func @transform_7(%arg0: i32) -> (i32, i32) {
    %c0_i32 = arith.constant 0 : i32
    %c0_i32_0 = arith.constant 0 : i32
    return %arg0, %c0_i32 : i32, i32
  }
}

</mosaic_0001>

<bundles_post_ra>
// kernel: tpu_custom_call.1
= control target key start
LH: loop header
LB: loop body
LE: loop exit
PB: predicated region body
PF: predicated region fallthrough
CT: control target
= control target key end

     0   :  { %12 = vsyncpa [#allocation3], 0  ;;  %s913_s0 = inlined_call_operand.hbm [shape: f32[16,32], index: 0, kind: input, shape index: {}]   ;;  %s914_s1 = inlined_call_operand.hbm [shape: bf16[32,128], index: 1, kind: input, shape index: {}]   ;;  %s915_s2 = inlined_call_operand.vmem [shape: f32[1,128], index: 2, kind: input, shape index: {}]   ;;  %s916_s3 = inlined_call_operand.hbm [shape: bf16[128,128], index: 3, kind: input, shape index: {}]   ;;  %s917_s4 = inlined_call_operand.vmem [shape: f32[1,128], index: 4, kind: input, shape index: {}]   ;;  %s918_s5 = inlined_call_operand.hbm [shape: bf16[128,128], index: 5, kind: input, shape index: {}]   ;;  %s919_s6 = inlined_call_operand.vmem [shape: f32[1,128], index: 6, kind: input, shape index: {}]   ;;  %s920_s7 = inlined_call_operand.hbm [shape: bf16[16,128], index: 7, kind: output, shape index: {}]  }
   0x1   :  { %13 = vsyncpa [#allocation6], 0 }
   0x2   :  { %14 = vsyncpa [#allocation9], 0 }
   0x3   :  { %15 = vsyncpa [#allocation4], 0  ;;  %s750_s24 = smov [#allocation5]   ;;  %s632_s28 = scalar_lea.hbm %s914_s1, 256 }
   0x4   :  { %s33_s25 = sshll.u32 %s750_s24, 4  ;;  %p633_p0 = scmp.ne.s32.totalorder %s914_s1, %s632_s28  ;;  %s34_s25 = int_to_ptr.vmem [resolvable:$true] %s33_s25 }
   0x5   :  { %p636_p1 = scmp.lt.u32.totalorder %s632_s28, %s914_s1 }
   0x7   :  { %p638_p2 = pnand %p636_p1, %p633_p0 }
   0x9   :  { %641 = shalt.err (!%p638_p2)
}
   0xa   :  { %s642_s10 = scalar_lea.vmem %s34_s25, 256  ;;  %p647_p4 = scmp.lt.s32.totalorder %s34_s25, %s34_s25 }
   0xb   :  { %p643_p3 = scmp.ne.s32.totalorder %s34_s25, %s642_s10  ;;  %p648_p5 = scmp.lt.s32.totalorder %s642_s10, %s642_s10 }
   0xd   :  { %p649_p6 = por %p648_p5, %p647_p4 }
   0xf   :  { %p650_p7 = pnand %p649_p6, %p643_p3 }
  0x11   :  { %653 = shalt.err (!%p650_p7)
}
  0x12   :  { %s751_s11 = smov 64   ;;  %s752_s12 = smov 4  }
  0x13   :  { %39 = dma.hbm_to_vmem [thread:$0]  %s914_s1, 256, %s34_s25, [#allocation6], %s751_s11, %s751_s11, %s752_s12  }
  0x14   :  { %s753_s15 = smov [#allocation2]   ;;  %s654_s19 = scalar_lea.hbm %s913_s0, 256 }
  0x15   :  { %s21_s16 = sshll.u32 %s753_s15, 4  ;;  %p655_p8 = scmp.ne.s32.totalorder %s913_s0, %s654_s19  ;;  %s22_s16 = int_to_ptr.vmem [resolvable:$true] %s21_s16 }
  0x16   :  { %p658_p9 = scmp.lt.u32.totalorder %s654_s19, %s913_s0 }
  0x18   :  { %p660_p10 = pnand %p658_p9, %p655_p8 }
  0x1a   :  { %663 = shalt.err (!%p660_p10)
}
  0x1b   :  { %s664_s24 = scalar_lea.vmem %s22_s16, 256  ;;  %p669_p12 = scmp.lt.s32.totalorder %s22_s16, %s22_s16 }
  0x1c   :  { %p665_p11 = scmp.ne.s32.totalorder %s22_s16, %s664_s24  ;;  %p670_p13 = scmp.lt.s32.totalorder %s664_s24, %s664_s24 }
  0x1e   :  { %p671_p0 = por %p670_p13, %p669_p12 }
  0x20   :  { %p672_p1 = pnand %p671_p0, %p665_p11 }
  0x22   :  { %675 = shalt.err (!%p672_p1)
}
  0x23   :  { %s754_s1 = smov 128   ;;  %s755_s25 = smov 8  }
  0x24   :  { %27 = dma.hbm_to_vmem [thread:$0]  %s913_s0, 256, %s22_s16, [#allocation3], %s754_s1, %s754_s1, %s755_s25  }
  0x25   :  { %s756_s28 = smov [#allocation7]   ;;  %s757_s30 = smov [#allocation8]  }
  0x26   :  { %s47_s29 = sshll.u32 %s756_s28, 4  ;;  %s61_s8 = sshll.u32 %s757_s30, 4  ;;  %s48_s29 = int_to_ptr.vmem [resolvable:$true] %s47_s29  ;;  %s828_s8 = int_to_ptr.vmem [resolvable:$true] %s61_s8 }
  0x27   :  { %s676_s13 = scalar_lea.hbm %s916_s3, 1024 }
  0x28   :  { %p677_p2 = scmp.ne.s32.totalorder %s916_s3, %s676_s13  ;;  %p680_p3 = scmp.lt.u32.totalorder %s676_s13, %s916_s3 }
  0x2a   :  { %p682_p4 = pnand %p680_p3, %p677_p2 }
  0x2c   :  { %685 = shalt.err (!%p682_p4)
}
  0x2d   :  { %s686_s0 = scalar_lea.vmem %s48_s29, 1024  ;;  %p691_p6 = scmp.lt.s32.totalorder %s48_s29, %s48_s29 }
  0x2e   :  { %p687_p5 = scmp.ne.s32.totalorder %s48_s29, %s686_s0  ;;  %p692_p7 = scmp.lt.s32.totalorder %s686_s0, %s686_s0 }
  0x30   :  { %p693_p8 = por %p692_p7, %p691_p6 }
  0x32   :  { %p694_p9 = pnand %p693_p8, %p687_p5 }
  0x34   :  { %697 = shalt.err (!%p694_p9)
}
  0x35   :  { %53 = dma.hbm_to_vmem [thread:$0]  %s916_s3, 1024, %s48_s29, [#allocation6], %s751_s11, %s751_s11, %s752_s12  }
  0x36   :  { %s698_s22 = scalar_lea.hbm %s918_s5, 1024 }
  0x37   :  { %p699_p10 = scmp.ne.s32.totalorder %s918_s5, %s698_s22  ;;  %p702_p11 = scmp.lt.u32.totalorder %s698_s22, %s918_s5 }
  0x39   :  { %p704_p12 = pnand %p702_p11, %p699_p10 }
  0x3b   :  { %707 = shalt.err (!%p704_p12)
}
  0x3c   :  { %s708_s26 = scalar_lea.vmem %s828_s8, 1024  ;;  %p713_p0 = scmp.lt.s32.totalorder %s828_s8, %s828_s8 }
  0x3d   :  { %p709_p13 = scmp.ne.s32.totalorder %s828_s8, %s708_s26  ;;  %p714_p1 = scmp.lt.s32.totalorder %s708_s26, %s708_s26 }
  0x3f   :  { %p715_p2 = por %p714_p1, %p713_p0 }
  0x41   :  { %p716_p3 = pnand %p715_p2, %p709_p13 }
  0x43   :  { %719 = shalt.err (!%p716_p3)
}
  0x44   :  { %67 = dma.hbm_to_vmem [thread:$0]  %s918_s5, 1024, %s828_s8, [#allocation9], %s751_s11, %s751_s11, %s752_s12  }
  0x45   :  { %742 = dma.done.wait [#allocation3], 256  }
  0x46   :  { %743 = vsyncadd [#allocation3], 4294967040 }
  0x47   :  { %744 = dma.done.wait [#allocation6], 1280  }
  0x48   :  { %745 = vsyncadd [#allocation6], 4294966016 }
  0x49   :  { %746 = dma.done.wait [#allocation9], 1024  }
  0x4a   :  { %747 = vsyncadd [#allocation9], 4294966272  ;;  %v758_v0 = vmov 0.0   ;;  %vm759_vm0 = vmmov 0   ;;  %v606_v1 = vld [vmem:[#allocation5] sm:$0xff]   ;;  %v607_v2 = vld [vmem:[#allocation5 + $0x8] sm:$0xff]   ;;  %v279_v34 = vlaneseq }
  0x4b   :  { %547 = vmatprep.subr.bf16.mxu0 %v758_v0  ;;  %551 = vmatprep.mubr.msk.bf16.mxu0 %vm759_vm0, %v758_v0  ;;  %v83_v3 = vld [vmem:[#allocation2] sm:$0xff]  ;;  %v84_v4 = vld [vmem:[#allocation2 + $0x8] sm:$0xff]  ;;  %vm109_vm1 = vcmask 261120   ;;  %v610_v8 = vld [vmem:[#allocation7 + $0x10] sm:$0xff]  }
  0x4c   :  { %555 = vmatprep.subr.bf16.mxu1 %v758_v0  ;;  %571 = vmatprep.mubr.msk.bf16.mxu1 %vm759_vm0, %v758_v0  ;;  %v608_v5 = vld [vmem:[#allocation7] sm:$0xff]   ;;  %v85_v6 = vpack.c.bf16 %v84_v4, %v83_v3  ;;  %v609_v7 = vld [vmem:[#allocation7 + $0x8] sm:$0xff]   ;;  %v611_v9 = vld [vmem:[#allocation7 + $0x18] sm:$0xff]   ;;  %v280_v35 = vshrl.u32 %v279_v34, 7  ;;  %v287_v37 = vand.u32 127, %v279_v34 }
  0x4d   :  { %548 = vmatpush3.bf16.msra.mxu0 %v606_v1  ;;  %556 = vmatpush3.bf16.msra.mxu1 %v608_v5  ;;  %v612_v10 = vld [vmem:[#allocation7 + $0x20] sm:$0xff]   ;;  %v613_v11 = vld [vmem:[#allocation7 + $0x28] sm:$0xff]   ;;  %v614_v12 = vld [vmem:[#allocation7 + $0x30] sm:$0xff]  }
  0x4e   :  { %549 = vmatprep.subr.bf16.mxu0 %v758_v0  ;;  %557 = vmatprep.subr.bf16.mxu1 %v758_v0  ;;  %v615_v13 = vld [vmem:[#allocation7 + $0x38] sm:$0xff]   ;;  %v616_v14 = vld [vmem:[#allocation8] sm:$0xff]   ;;  %v617_v15 = vld [vmem:[#allocation8 + $0x8] sm:$0xff]   ;;  %v281_v36 = vadd.s32 8, %v280_v35  ;;  %v288_v38 = vmul.u32 128, %v280_v35 }
  0x4f   :  { %v618_v16 = vld [vmem:[#allocation8 + $0x10] sm:$0xff]   ;;  %v619_v17 = vld [vmem:[#allocation8 + $0x18] sm:$0xff]   ;;  %v620_v18 = vld [vmem:[#allocation8 + $0x20] sm:$0xff]  }
  0x50   :  { %v486_v19 = vld [vmem:[%s915_s2] ss:$0 sm:$0xff]  ;;  %v621_v31 = vld [vmem:[#allocation8 + $0x28] sm:$0xff]   ;;  %v622_v32 = vld [vmem:[#allocation8 + $0x30] sm:$0xff]   ;;  %v289_v39 = vmul.u32 128, %v281_v36  ;;  %v290_v40 = vadd.s32 %v288_v38, %v287_v37 }
  0x51   :  { %550 = vmatpush3.bf16.msra.mxu0 %v607_v2  ;;  %558 = vmatpush3.bf16.msra.mxu1 %v609_v7  ;;  %v623_v33 = vld [vmem:[#allocation8 + $0x38] sm:$0xff]   ;;  %v490_v58 = vld [vmem:[%s917_s4] ss:$0 sm:$0xff] }
  0x52   :  { %575 = vmatprep.subr.bf16.mxu0 %v758_v0  ;;  %559 = vmatprep.subr.bf16.mxu1 %v758_v0  ;;  %v291_v41 = vadd.s32 %v289_v39, %v287_v37  ;;  %v292_v42 = vadd.s32 2135587861, %v290_v40 }
  0x54   :  { %552 = vmatmul.mubr.msk.bf16.vlgmr.msra.gmra.mrb[0].mxu0 %vm109_vm1, %v85_v6  ;;  %v293_v43 = vadd.s32 2135587861, %v291_v41  ;;  %v499_v44 = vshrl.u32 %v292_v42, 16 }
  0x55   :  { %591 = vmatprep.mubr.msk.bf16.mxu0 %vm759_vm0, %v758_v0  ;;  %560 = vmatpush3.bf16.msra.mxu1 %v610_v8 }
  0x56   :  { %561 = vmatprep.subr.bf16.mxu1 %v758_v0  ;;  %576 = vmatpush3.bf16.msra.mxu0 %v616_v14  ;;  %v500_v45 = vshrl.u32 %v293_v43, 16  ;;  %v298_v46 = vxor.u32 %v499_v44, %v292_v42 }
  0x57   :  { %577 = vmatprep.subr.bf16.mxu0 %v758_v0 }
  0x58   :  { %v299_v47 = vxor.u32 %v500_v45, %v293_v43  ;;  %v300_v48 = vmul.u32 2246822507, %v298_v46 }
  0x59   :  { %562 = vmatpush3.bf16.msra.mxu1 %v611_v9 }
  0x5a   :  { %563 = vmatprep.subr.bf16.mxu1 %v758_v0  ;;  %578 = vmatpush3.bf16.msra.mxu0 %v617_v15  ;;  %v301_v49 = vmul.u32 2246822507, %v299_v47  ;;  %v501_v50 = vshrl.u32 %v300_v48, 13 }
  0x5b   :  { %579 = vmatprep.subr.bf16.mxu0 %v758_v0 }
  0x5c   :  { %v502_v51 = vshrl.u32 %v301_v49, 13  ;;  %v306_v52 = vxor.u32 %v501_v50, %v300_v48 }
  0x5d   :  { %564 = vmatpush3.bf16.msra.mxu1 %v612_v10 }
  0x5e   :  { %565 = vmatprep.subr.bf16.mxu1 %v758_v0  ;;  %580 = vmatpush3.bf16.msra.mxu0 %v618_v16  ;;  %v307_v53 = vxor.u32 %v502_v51, %v301_v49  ;;  %v308_v54 = vmul.u32 3266489909, %v306_v52 }
  0x5f   :  { %581 = vmatprep.subr.bf16.mxu0 %v758_v0 }
  0x60   :  { %v309_v55 = vmul.u32 3266489909, %v307_v53  ;;  %v503_v56 = vshrl.u32 %v308_v54, 16 }
  0x61   :  { %566 = vmatpush3.bf16.msra.mxu1 %v613_v11 }
  0x62   :  { %567 = vmatprep.subr.bf16.mxu1 %v758_v0  ;;  %582 = vmatpush3.bf16.msra.mxu0 %v619_v17  ;;  %v504_v57 = vshrl.u32 %v309_v55, 16  ;;  %v314_v59 = vxor.u32 %v503_v56, %v308_v54 }
  0x63   :  { %583 = vmatprep.subr.bf16.mxu0 %v758_v0 }
  0x64   :  { %v315_v60 = vxor.u32 %v504_v57, %v309_v55  ;;  %v316_v1 = vand.u32 1, %v314_v59 }
  0x65   :  { %568 = vmatpush3.bf16.msra.mxu1 %v614_v12  ;;  %v505_v12 = vld [vmem:[%s919_s6] ss:$0 sm:$0xff]  ;;  %s760_s6 = smov [#allocation10]  }
  0x66   :  { %569 = vmatprep.subr.bf16.mxu1 %v758_v0  ;;  %584 = vmatpush3.bf16.msra.mxu0 %v620_v18  ;;  %v317_v2 = vand.u32 1, %v315_v60  ;;  %vm318_vm6 = vcmp.eq.s32.totalorder %v316_v1, 0  ;;  %s472_s8 = sshll.u32 %s760_s6, 4  ;;  %s473_s8 = int_to_ptr.vmem [resolvable:$true] %s472_s8 }
  0x67   :  { %585 = vmatprep.subr.bf16.mxu0 %v758_v0  ;;  %s720_s9 = scalar_lea.vmem %s473_s8, 128  ;;  %p725_p5 = scmp.lt.s32.totalorder %s473_s8, %s473_s8 }
  0x68   :  { %vm319_vm7 = vcmp.eq.s32.totalorder %v317_v2, 0  ;;  %p721_p4 = scmp.ne.s32.totalorder %s473_s8, %s720_s9  ;;  %p726_p6 = scmp.lt.s32.totalorder %s720_s9, %s720_s9 }
  0x69   :  { %570 = vmatpush3.bf16.msra.mxu1 %v615_v13  ;;  %vm514_vm8 = vmpackc.low %vm319_vm7, %vm318_vm6 }
  0x6a   :  { %586 = vmatpush3.bf16.msra.mxu0 %v621_v31  ;;  %p727_p7 = por %p726_p6, %p725_p5 }
  0x6b   :  { %587 = vmatprep.subr.bf16.mxu0 %v758_v0 }
  0x6c   :  { %p728_p8 = pnand %p727_p7, %p721_p4 }
  0x6e   :  { %588 = vmatpush3.bf16.msra.mxu0 %v622_v32 }
  0x6f   :  { %589 = vmatprep.subr.bf16.mxu0 %v758_v0 }
  0x72   :  { %590 = vmatpush3.bf16.msra.mxu0 %v623_v33 }
 0x127   :  { %v147_v20 = vpop.f32.mrb[0].mxu0 }
 0x128   :  { %v148_v21 = vadd.f32 %v486_v19, %v147_v20  ;;  %v553_v22 = vpop.f32.mrb[1].mxu0 }
 0x129   :  { %v150_v23 = vpop.f32.mrb[2].mxu0 }
 0x12a   :  { %v156_v24 = vmul.f32 0.2, %v148_v21  ;;  %v151_v25 = vadd.f32 %v486_v19, %v150_v23  ;;  %v554_v26 = vpop.f32.mrb[3].mxu0  ;;  %vm154_vm2 = vcmp.gt.f32.partialorder %v148_v21, 0.0 }
 0x12c   :  { %vm155_vm3 = vcmp.gt.f32.partialorder %v151_v25, 0.0  ;;  %v157_v27 = vmul.f32 0.2, %v151_v25  ;;  %v158_v28 = vsel %vm154_vm2, %v148_v21, %v156_v24 }
 0x12e   :  { %v159_v29 = vsel %vm155_vm3, %v151_v25, %v157_v27 }
 0x12f   :  { %v160_v30 = vpack.c.bf16 %v159_v29, %v158_v28 }
 0x131   :  { %572 = vmatmul.mubr.bf16.vlgmr.msra.gmra.mrb[0].mxu1 %v160_v30 }
 0x204   :  { %v266_v61 = vpop.f32.mrb[0].mxu1 }
 0x205   :  { %v267_v62 = vadd.f32 %v490_v58, %v266_v61  ;;  %v573_v63 = vpop.f32.mrb[1].mxu1 }
 0x206   :  { %v269_v0 = vpop.f32.mrb[2].mxu1 }
 0x207   :  { %vm273_vm4 = vcmp.gt.f32.partialorder %v267_v62, 0.0  ;;  %v275_v3 = vmul.f32 0.2, %v267_v62  ;;  %v270_v4 = vadd.f32 %v490_v58, %v269_v0  ;;  %v574_v5 = vpop.f32.mrb[3].mxu1 }
 0x209   :  { %v277_v6 = vsel %vm273_vm4, %v267_v62, %v275_v3  ;;  %vm274_vm5 = vcmp.gt.f32.partialorder %v270_v4, 0.0  ;;  %v276_v7 = vmul.f32 0.2, %v270_v4 }
 0x20a   :  { %v320_v9 = vmul.f32 2.0, %v277_v6 }
 0x20b   :  { %v278_v8 = vsel %vm274_vm5, %v270_v4, %v276_v7 }
 0x20c   :  { %v321_v10 = vmul.f32 2.0, %v278_v8 }
 0x20e   :  { %v515_v11 = vpack.c.bf16 %v321_v10, %v320_v9 }
 0x210   :  { %592 = vmatmul.mubr.msk.bf16.vlgmr.msra.gmra.mrb[4].mxu0 %vm514_vm8, %v515_v11 }
 0x2e3   :  { %v430_v13 = vpop.f32.mrb[4].mxu0 }
 0x2e4   :  { %v431_v14 = vadd.f32 %v505_v12, %v430_v13  ;;  %v593_v15 = vpop.f32.mrb[5].mxu0 }
 0x2e5   :  { %v433_v16 = vpop.f32.mrb[6].mxu0 }
 0x2e6   :  { %v437_v17 = vand.u32 2147483647, %v431_v14  ;;  %v434_v18 = vadd.f32 %v505_v12, %v433_v16  ;;  %v594_v19 = vpop.f32.mrb[7].mxu0  ;;  %vm451_vm9 = vcmp.ge.f32.partialorder %v431_v14, 0.0 }
 0x2e8   :  { %v439_v20 = vsub.f32 0.0, %v437_v17  ;;  %v438_v21 = vand.u32 2147483647, %v434_v18  ;;  %vm452_vm10 = vcmp.ge.f32.partialorder %v434_v18, 0.0 }
 0x2ea   :  { %v441_v22 = vmul.f32 1.442695, %v439_v20  ;;  %v440_v23 = vsub.f32 0.0, %v438_v21 }
 0x2ec   :  { %624 = vpow2.f32 %v441_v22  ;;  %v443_v24 = vmul.f32 1.442695, %v440_v23 }
 0x2ee   :  { %626 = vpow2.f32 %v443_v24 }
 0x2f6   :  { %v625_v25 = vpop.eup %624 }
 0x2f7   :  { %v445_v26 = vadd.f32 1.0, %v625_v25 }
 0x2f8   :  { %v627_v27 = vpop.eup %626 }
 0x2f9   :  { %628 = vrcp.f32 %v445_v26  ;;  %v446_v28 = vadd.f32 1.0, %v627_v27 }
 0x2fb   :  { %630 = vrcp.f32 %v446_v28 }
 0x303   :  { %v629_v29 = vpop.eup %628 }
 0x304   :  { %v453_v30 = vsub.f32 1.0, %v629_v29 }
 0x305   :  { %v631_v31 = vpop.eup %630 }
 0x306   :  { %v454_v32 = vsub.f32 1.0, %v631_v31  ;;  %v455_v33 = vsel %vm451_vm9, %v629_v29, %v453_v30 }
 0x308   :  { %v456_v34 = vsel %vm452_vm10, %v631_v31, %v454_v32 }
 0x309   :  { %v524_v35 = vpack.c.bf16 %v456_v34, %v455_v33 }
 0x30b   :  { %525 = vst [vmem:[#allocation10] sm:$0xff] %v524_v35  }
 0x30c   :  { %731 = shalt.err (!%p728_p8)
}
 0x30d   :  { %s732_s14 = scalar_lea.hbm %s920_s7, 128 }
 0x30e   :  { %p733_p9 = scmp.ne.s32.totalorder %s920_s7, %s732_s14  ;;  %p736_p10 = scmp.lt.u32.totalorder %s732_s14, %s920_s7 }
 0x310   :  { %p738_p11 = pnand %p736_p10, %p733_p9 }
 0x312   :  { %741 = shalt.err (!%p738_p11)
}
 0x313   :  { %478 = dma.vmem_to_hbm [thread:$0]  %s473_s8, 128, %s920_s7, [#allocation4], %s751_s11, %s751_s11, %s752_s12  }
 0x314   :  { %748 = dma.done.wait [#allocation4], 128  }
 0x315   :  { %749 = vsyncadd [#allocation4], 4294967168 }
 0x316   :  { %482 = vsyncpa [#allocation3], 1 }
 0x317   :  { %483 = vsyncpa [#allocation6], 1 }
 0x318   :  { %484 = vsyncpa [#allocation9], 1 }
 0x319   :  { %485 = vsyncpa [#allocation4], 1 }

</bundles_post_ra>
